<compile_context>
chip_gen: v7x
topology: tpu7x:2x2x1
jax: 0.10.0
libtpu: 0.0.40
codegen_flags: <defaults>
</compile_context>

<pallas_src>
import functools

import jax
import jax.numpy as jnp
from jax.experimental import pallas as pl
from jax.experimental.pallas import tpu as pltpu

LANES = 128
MAX_BLOCK_ROWS = 8192   # 8192 * 128 * 4 B = 4 MiB per f32 input per block
NUM_SPLITS = 2          # leading "parallel" grid axis (2 TCs on v7x)


def _bce_kernel(p_ref, t_ref, o_ref, acc_ref, *,
                n_valid, block_rows, blocks_per_split, acc_rows):
    s = pl.program_id(0)          # split (parallel axis)
    j = pl.program_id(1)          # block within split (arbitrary axis)
    nj = pl.num_programs(1)

    @pl.when(j == 0)
    def _():
        acc_ref[...] = jnp.zeros_like(acc_ref)

    gb = s * blocks_per_split + j  # global (unclamped) block index

    x = p_ref[...].astype(jnp.float32)
    t = t_ref[...].astype(jnp.float32)

    # softplus(x) = max(x,0) + log1p(exp(-|x|));  BCE-with-logits identity:
    #   loss = t*softplus(-x) + (1-t)*softplus(x) = softplus(x) - t*x
    # PyTorch's log clamp at -100 kept as min(softplus, 100); diverges from the
    # eager sigmoid path only for |logit| > 100 (where PyTorch clamps).
    sp = jnp.maximum(x, 0.0) + jnp.log1p(jnp.exp(-jnp.abs(x)))
    sp = jnp.minimum(sp, jnp.float32(100.0))
    loss = sp - t * x

    full_rows = n_valid // LANES      # fully-valid (row,128) rows
    tail_cols = n_valid % LANES       # valid lanes in row `full_rows`

    # Does this block extend past the valid region (ragged / padded / OOB)?
    needs_mask = (gb + 1) * block_rows > full_rows

    def _accumulate(vals):
        # Fold (block_rows,128) -> (acc_rows,128) with plain vreg adds.
        acc_ref[...] += vals.reshape(-1, acc_rows, LANES).sum(axis=0)

    @pl.when(jnp.logical_not(needs_mask))
    def _():
        _accumulate(loss)

    @pl.when(needs_mask)
    def _():
        row = jax.lax.broadcasted_iota(jnp.int32, loss.shape, 0)
        col = jax.lax.broadcasted_iota(jnp.int32, loss.shape, 1)
        grow = gb * block_rows + row          # global row index (int32-safe)
        valid = (grow < full_rows) | ((grow == full_rows) & (col < tail_cols))
        _accumulate(jnp.where(valid, loss, 0.0))

    @pl.when(j == nj - 1)
    def _():
        o_ref[0, 0] = jnp.sum(acc_ref[...])   # per-split partial sum


def bce_loss(pred, targets):
    """Mean BCE of sigmoid(pred) vs targets, matching the PyTorch module."""
    pred_flat = pred.reshape(-1)
    targ_flat = targets.reshape(-1)
    n = pred_flat.shape[0]

    rem = n % LANES
    if rem:
        # TODO(synk): a 1-D BlockSpec path would avoid this (rare) HBM copy.
        pad = LANES - rem
        pred_flat = jnp.pad(pred_flat, (0, pad))
        targ_flat = jnp.pad(targ_flat, (0, pad))

    rows = pred_flat.shape[0] // LANES
    pred2d = pred_flat.reshape(rows, LANES)
    targ2d = targ_flat.reshape(rows, LANES)

    block_rows = min(MAX_BLOCK_ROWS, rows)   # full dim if rows < MAX_BLOCK_ROWS
    total_blocks = pl.cdiv(rows, block_rows)
    num_splits = min(NUM_SPLITS, total_blocks)
    blocks_per_split = pl.cdiv(total_blocks, num_splits)

    if block_rows % 32 == 0:
        acc_rows = 32          # more independent accumulation chains (ILP)
    elif block_rows % 8 == 0:
        acc_rows = 8
    else:
        acc_rows = block_rows  # tiny inputs: accumulator is the whole block

    def in_map(s, j):
        gb = s * blocks_per_split + j
        # Clamp fully-out-of-range blocks onto the last real block; the tail
        # mask zeroes their contribution.
        return (jnp.minimum(gb, total_blocks - 1), 0)

    kernel = functools.partial(
        _bce_kernel,
        n_valid=n,
        block_rows=block_rows,
        blocks_per_split=blocks_per_split,
        acc_rows=acc_rows,
    )

    bytes_accessed = (pred2d.size * pred2d.dtype.itemsize
                      + targ2d.size * targ2d.dtype.itemsize
                      + 4 * num_splits)

    partials = pl.pallas_call(
        kernel,
        out_shape=jax.ShapeDtypeStruct((num_splits, 1), jnp.float32),
        grid_spec=pltpu.PrefetchScalarGridSpec(
            num_scalar_prefetch=0,
            grid=(num_splits, blocks_per_split),
            in_specs=[
                pl.BlockSpec((block_rows, LANES), in_map),
                pl.BlockSpec((block_rows, LANES), in_map),
            ],
            out_specs=pl.BlockSpec(
                (1, 1), lambda s, j: (s, 0), memory_space=pltpu.SMEM
            ),
            scratch_shapes=[pltpu.VMEM((acc_rows, LANES), jnp.float32)],
        ),
        compiler_params=pltpu.CompilerParams(
            dimension_semantics=("parallel", "arbitrary"),
            vmem_limit_bytes=40 * 1024 * 1024,
        ),
        cost_estimate=pl.CostEstimate(
            flops=10 * n,
            transcendentals=2 * n,
            bytes_accessed=int(bytes_accessed),
        ),
    )(pred2d, targ2d)

    return jnp.sum(partials) / jnp.float32(n)


def bce_ref(pred, targets):
    # Reference follows the PyTorch path: sigmoid -> BCE with log clamp -100.
    p = jax.nn.sigmoid(pred.reshape(-1).astype(jnp.float32))
    t = targets.reshape(-1).astype(jnp.float32)
    log_p = jnp.maximum(jnp.log(p), -100.0)
    log_1mp = jnp.maximum(jnp.log(1.0 - p), -100.0)
    return jnp.mean(-(t * log_p + (1.0 - t) * log_1mp))


if __name__ == "__main__":
    key = jax.random.PRNGKey(0)
    k1, k2 = jax.random.split(key)
    # Small NCHW shapes: batch=2, channels=4, spatial=16x16 (raw logits).
    pred = jax.random.normal(k1, (2, 4, 16, 16), dtype=jnp.float32)
    targets = (
        jax.random.uniform(k2, (2, 4, 16, 16)) > 0.5
    ).astype(jnp.float32)

    loss = jax.block_until_ready(bce_loss(pred, targets))
    ref = jax.block_until_ready(bce_ref(pred, targets))

    assert jnp.allclose(loss, ref, rtol=1e-5, atol=1e-6), (loss, ref)
    print("KERNEL_OK")
</pallas_src>

<mosaic_0001>
module attributes {stable_mosaic.version = 11 : i64} {
  func.func @_bce_kernel(%arg0: i32, %arg1: i32, %arg2: memref<16x128xf32, #tpu.memory_space<vmem>>, %arg3: memref<16x128xf32, #tpu.memory_space<vmem>>, %arg4: memref<1x1xf32, #tpu.memory_space<smem>>, %arg5: memref<8x128xf32, #tpu.memory_space<vmem>>) attributes {dimension_semantics = [#tpu.dimension_semantics<parallel>, #tpu.dimension_semantics<arbitrary>], iteration_bounds = array<i64: 1, 1>, scalar_prefetch = 0 : i64, scratch_operands = 1 : i64, tpu.core_type = #tpu.core_type<tc>, window_params = [{transform_indices = @transform_0, window_bounds = array<i64: 16, 128>}, {transform_indices = @transform_1, window_bounds = array<i64: 16, 128>}, {transform_indices = @transform_2, window_bounds = array<i64: 1, 1>}]} {
    %c0_i32 = arith.constant 0 : i32
    %0 = arith.cmpi eq, %arg1, %c0_i32 : i32
    %1 = arith.extui %0 : i1 to i32
    %c0_i32_0 = arith.constant 0 : i32
    %2 = arith.cmpi ne, %1, %c0_i32_0 : i32
    scf.if %2 {
      %cst_12 = arith.constant 0.000000e+00 : f32
      %30 = vector.broadcast %cst_12 : f32 to vector<8x128xf32>
      %c0_13 = arith.constant 0 : index
      %c0_14 = arith.constant 0 : index
      %31 = vector.load %arg5[%c0_13, %c0_14] : memref<8x128xf32, #tpu.memory_space<vmem>>, vector<8x128xf32>
      tpu.vector_store %arg5[%c0_13, %c0_14], %30 {strides = array<i32>} : memref<8x128xf32, #tpu.memory_space<vmem>>, vector<8x128xf32>,
    } else {
    }
    %c1_i32 = arith.constant 1 : i32
    %3 = arith.muli %arg0, %c1_i32 : i32
    %4 = arith.addi %3, %arg1 : i32
    %c0 = arith.constant 0 : index
    %c0_1 = arith.constant 0 : index
    %5 = vector.load %arg2[%c0, %c0_1] : memref<16x128xf32, #tpu.memory_space<vmem>>, vector<16x128xf32>
    %c0_2 = arith.constant 0 : index
    %c0_3 = arith.constant 0 : index
    %6 = vector.load %arg3[%c0_2, %c0_3] : memref<16x128xf32, #tpu.memory_space<vmem>>, vector<16x128xf32>
    %cst = arith.constant 0.000000e+00 : f32
    %7 = vector.broadcast %cst : f32 to vector<16x128xf32>
    %8 = arith.maximumf %5, %7 : vector<16x128xf32>
    %9 = math.absf %5 : vector<16x128xf32>
    %cst_4 = arith.constant 0.000000e+00 : f32
    %10 = vector.broadcast %cst_4 : f32 to vector<16x128xf32>
    %11 = arith.subf %10, %9 : vector<16x128xf32>
    %12 = math.exp %11 : vector<16x128xf32>
    %13 = math.log1p %12 : vector<16x128xf32>
    %14 = arith.addf %8, %13 : vector<16x128xf32>
    %cst_5 = arith.constant 1.000000e+02 : f32
    %15 = vector.broadcast %cst_5 : f32 to vector<16x128xf32>
    %16 = arith.minimumf %14, %15 : vector<16x128xf32>
    %17 = arith.mulf %6, %5 : vector<16x128xf32>
    %18 = arith.subf %16, %17 : vector<16x128xf32>
    %c1_i32_6 = arith.constant 1 : i32
    %19 = arith.addi %4, %c1_i32_6 : i32
    %c16_i32 = arith.constant 16 : i32
    %20 = arith.muli %19, %c16_i32 : i32
    %c16_i32_7 = arith.constant 16 : i32
    %21 = arith.cmpi sgt, %20, %c16_i32_7 : i32
    %true = arith.constant true
    %22 = arith.xori %21, %true : i1
    %23 = arith.extui %22 : i1 to i32
    %c0_i32_8 = arith.constant 0 : i32
    %24 = arith.cmpi ne, %23, %c0_i32_8 : i32
    scf.if %24 {
      %c0_12 = arith.constant 0 : index
      %c0_13 = arith.constant 0 : index
      %30 = vector.load %arg5[%c0_12, %c0_13] : memref<8x128xf32, #tpu.memory_space<vmem>>, vector<8x128xf32>
      %31 = vector.shape_cast %18 : vector<16x128xf32> to vector<2x8x128xf32>
      %cst_14 = arith.constant dense<0.000000e+00> : vector<8x128xf32>
      %32 = vector.multi_reduction <add>, %31, %cst_14 [0] : vector<2x8x128xf32> to vector<8x128xf32>
      %33 = arith.addf %30, %32 : vector<8x128xf32>
      %c0_15 = arith.constant 0 : index
      %c0_16 = arith.constant 0 : index
      %34 = vector.load %arg5[%c0_15, %c0_16] : memref<8x128xf32, #tpu.memory_space<vmem>>, vector<8x128xf32>
      tpu.vector_store %arg5[%c0_15, %c0_16], %33 {strides = array<i32>} : memref<8x128xf32, #tpu.memory_space<vmem>>, vector<8x128xf32>,
    } else {
    }
    %25 = arith.extui %21 : i1 to i32
    %c0_i32_9 = arith.constant 0 : i32
    %26 = arith.cmpi ne, %25, %c0_i32_9 : i32
    scf.if %26 {
      %30 = tpu.iota {dimensions = array<i32: 0>} : vector<16x128xi32>
      %31 = tpu.iota {dimensions = array<i32: 1>} : vector<16x128xi32>
      %c16_i32_12 = arith.constant 16 : i32
      %32 = arith.muli %4, %c16_i32_12 : i32
      %33 = vector.broadcast %32 : i32 to vector<16x128xi32>
      %34 = arith.addi %33, %30 : vector<16x128xi32>
      %c16_i32_13 = arith.constant 16 : i32
      %35 = vector.broadcast %c16_i32_13 : i32 to vector<16x128xi32>
      %36 = arith.cmpi slt, %34, %35 : vector<16x128xi32>
      %c16_i32_14 = arith.constant 16 : i32
      %37 = vector.broadcast %c16_i32_14 : i32 to vector<16x128xi32>
      %38 = arith.cmpi eq, %34, %37 : vector<16x128xi32>
      %c0_i32_15 = arith.constant 0 : i32
      %39 = vector.broadcast %c0_i32_15 : i32 to vector<16x128xi32>
      %40 = arith.cmpi slt, %31, %39 : vector<16x128xi32>
      %41 = arith.andi %38, %40 : vector<16x128xi1>
      %42 = arith.ori %36, %41 : vector<16x128xi1>
      %cst_16 = arith.constant 0.000000e+00 : f32
      %43 = vector.broadcast %cst_16 : f32 to vector<16x128xf32>
      %44 = arith.select %42, %18, %43 : vector<16x128xi1>, vector<16x128xf32>
      %c0_17 = arith.constant 0 : index
      %c0_18 = arith.constant 0 : index
      %45 = vector.load %arg5[%c0_17, %c0_18] : memref<8x128xf32, #tpu.memory_space<vmem>>, vector<8x128xf32>
      %46 = vector.shape_cast %44 : vector<16x128xf32> to vector<2x8x128xf32>
      %cst_19 = arith.constant dense<0.000000e+00> : vector<8x128xf32>
      %47 = vector.multi_reduction <add>, %46, %cst_19 [0] : vector<2x8x128xf32> to vector<8x128xf32>
      %48 = arith.addf %45, %47 : vector<8x128xf32>
      %c0_20 = arith.constant 0 : index
      %c0_21 = arith.constant 0 : index
      %49 = vector.load %arg5[%c0_20, %c0_21] : memref<8x128xf32, #tpu.memory_space<vmem>>, vector<8x128xf32>
      tpu.vector_store %arg5[%c0_20, %c0_21], %48 {strides = array<i32>} : memref<8x128xf32, #tpu.memory_space<vmem>>, vector<8x128xf32>,
    } else {
    }
    %c0_i32_10 = arith.constant 0 : i32
    %27 = arith.cmpi eq, %arg1, %c0_i32_10 : i32
    %28 = arith.extui %27 : i1 to i32
    %c0_i32_11 = arith.constant 0 : i32
    %29 = arith.cmpi ne, %28, %c0_i32_11 : i32
    scf.if %29 {
      %c0_12 = arith.constant 0 : index
      %c0_13 = arith.constant 0 : index
      %30 = vector.load %arg5[%c0_12, %c0_13] : memref<8x128xf32, #tpu.memory_space<vmem>>, vector<8x128xf32>
      %31 = vector.shape_cast %30 : vector<8x128xf32> to vector<1x8x128xf32>
      %cst_14 = arith.constant dense<0.000000e+00> : vector<1xf32>
      %32 = vector.multi_reduction <add>, %31, %cst_14 [1, 2] : vector<1x8x128xf32> to vector<1xf32>
      %33 = vector.shape_cast %32 : vector<1xf32> to vector<1x1x1xf32>
      %34 = vector.extract %33[0, 0, 0] : f32 from vector<1x1x1xf32>
      %c0_15 = arith.constant 0 : index
      %c0_16 = arith.constant 0 : index
      %35 = memref.load %arg4[%c0_15, %c0_16] : memref<1x1xf32, #tpu.memory_space<smem>>
      memref.store %34, %arg4[%c0_15, %c0_16] : memref<1x1xf32, #tpu.memory_space<smem>>
    } else {
    }
    return
  }
  func.func @transform_0(%arg0: i32, %arg1: i32) -> (i32, i32) {
    %c1_i32 = arith.constant 1 : i32
    %0 = arith.muli %arg0, %c1_i32 : i32
    %1 = arith.addi %0, %arg1 : i32
    %c0_i32 = arith.constant 0 : i32
    %2 = arith.minsi %1, %c0_i32 : i32
    %c0_i32_0 = arith.constant 0 : i32
    %c0_i32_1 = arith.constant 0 : i32
    return %2, %c0_i32_0 : i32, i32
  }
  func.func @transform_1(%arg0: i32, %arg1: i32) -> (i32, i32) {
    %c1_i32 = arith.constant 1 : i32
    %0 = arith.muli %arg0, %c1_i32 : i32
    %1 = arith.addi %0, %arg1 : i32
    %c0_i32 = arith.constant 0 : i32
    %2 = arith.minsi %1, %c0_i32 : i32
    %c0_i32_0 = arith.constant 0 : i32
    %c0_i32_1 = arith.constant 0 : i32
    return %2, %c0_i32_0 : i32, i32
  }
  func.func @transform_2(%arg0: i32, %arg1: i32) -> (i32, i32) {
    %c0_i32 = arith.constant 0 : i32
    %c0_i32_0 = arith.constant 0 : i32
    return %arg0, %c0_i32 : i32, i32
  }
}

</mosaic_0001>

<bundles_post_ra>
// kernel: tpu_custom_call.1
= control target key start
LH: loop header
LB: loop body
LE: loop exit
PB: predicated region body
PF: predicated region fallthrough
CT: control target
= control target key end

     0   :  { %7 = vsyncpa [#allocation4], 0  ;;  %s309_s0 = inlined_call_operand.hbm [shape: f32[16,128], index: 0, kind: input, shape index: {}]   ;;  %s310_s1 = inlined_call_operand.hbm [shape: f32[16,128], index: 1, kind: input, shape index: {}]   ;;  %s311_s2 = inlined_call_operand.hbm [shape: f32[1,1], index: 2, kind: output, shape index: {}]  }
   0x1   :  { %8 = vsyncpa [#allocation7], 0 }
   0x2   :  { %9 = vsyncpa [#allocation5], 0  ;;  %s253_s9 = smov [#allocation3]   ;;  %s193_s13 = scalar_lea.hbm %s309_s0, 256 }
   0x3   :  { %s21_s10 = sshll.u32 %s253_s9, 4  ;;  %p194_p0 = scmp.ne.s32.totalorder %s309_s0, %s193_s13  ;;  %s22_s10 = int_to_ptr.vmem [resolvable:$true] %s21_s10 }
   0x4   :  { %p197_p1 = scmp.lt.u32.totalorder %s193_s13, %s309_s0 }
   0x6   :  { %p199_p2 = pnand %p197_p1, %p194_p0 }
   0x8   :  { %202 = shalt.err (!%p199_p2)
}
   0x9   :  { %s203_s18 = scalar_lea.vmem %s22_s10, 256  ;;  %p208_p4 = scmp.lt.s32.totalorder %s22_s10, %s22_s10 }
   0xa   :  { %p204_p3 = scmp.ne.s32.totalorder %s22_s10, %s203_s18  ;;  %p209_p5 = scmp.lt.s32.totalorder %s203_s18, %s203_s18 }
   0xc   :  { %p210_p6 = por %p209_p5, %p208_p4 }
   0xe   :  { %p211_p7 = pnand %p210_p6, %p204_p3 }
  0x10   :  { %214 = shalt.err (!%p211_p7)
}
  0x11   :  { %s254_s19 = smov 128   ;;  %s255_s20 = smov 8  }
  0x12   :  { %27 = dma.hbm_to_vmem [thread:$0]  %s309_s0, 256, %s22_s10, [#allocation4], %s254_s19, %s254_s19, %s255_s20  }
  0x13   :  { %s256_s23 = smov [#allocation6]   ;;  %s215_s27 = scalar_lea.hbm %s310_s1, 256 }
  0x14   :  { %s39_s24 = sshll.u32 %s256_s23, 4  ;;  %p216_p8 = scmp.ne.s32.totalorder %s310_s1, %s215_s27  ;;  %s40_s24 = int_to_ptr.vmem [resolvable:$true] %s39_s24 }
  0x15   :  { %p219_p9 = scmp.lt.u32.totalorder %s215_s27, %s310_s1 }
  0x17   :  { %p221_p10 = pnand %p219_p9, %p216_p8 }
  0x19   :  { %224 = shalt.err (!%p221_p10)
}
  0x1a   :  { %s225_s4 = scalar_lea.vmem %s40_s24, 256  ;;  %p230_p12 = scmp.lt.s32.totalorder %s40_s24, %s40_s24 }
  0x1b   :  { %p226_p11 = scmp.ne.s32.totalorder %s40_s24, %s225_s4  ;;  %p231_p13 = scmp.lt.s32.totalorder %s225_s4, %s225_s4 }
  0x1d   :  { %p232_p0 = por %p231_p13, %p230_p12 }
  0x1f   :  { %p233_p1 = pnand %p232_p0, %p226_p11 }
  0x21   :  { %236 = shalt.err (!%p233_p1)
}
  0x22   :  { %45 = dma.hbm_to_vmem [thread:$0]  %s310_s1, 256, %s40_s24, [#allocation7], %s254_s19, %s254_s19, %s255_s20  }
  0x23   :  { %247 = dma.done.wait [#allocation4], 256  }
  0x24   :  { %248 = vsyncadd [#allocation4], 4294967040 }
  0x25   :  { %249 = dma.done.wait [#allocation7], 256  }
  0x26   :  { %250 = vsyncadd [#allocation7], 4294967040  ;;  %v66_v0 = vld [vmem:[#allocation3] sm:$0xff]  ;;  %v67_v1 = vld [vmem:[#allocation3 + $0x8] sm:$0xff]  ;;  %s237_s8 = scalar_lea.hbm %s311_s2, 16 }
  0x27   :  { %v72_v2 = vand.u32 2147483647, %v66_v0  ;;  %v73_v3 = vand.u32 2147483647, %v67_v1  ;;  %v70_v20 = vmax.f32 %v66_v0, 0.0  ;;  %v68_v23 = vld [vmem:[#allocation6] sm:$0xff]  ;;  %p238_p2 = scmp.ne.s32.totalorder %s311_s2, %s237_s8  ;;  %p241_p3 = scmp.lt.u32.totalorder %s237_s8, %s311_s2 }
  0x28   :  { %v71_v24 = vmax.f32 %v67_v1, 0.0  ;;  %v69_v26 = vld [vmem:[#allocation6 + $0x8] sm:$0xff]  ;;  %v102_v31 = vmul.f32 %v68_v23, %v66_v0 }
  0x29   :  { %v74_v4 = vsub.f32 0.0, %v72_v2  ;;  %v75_v5 = vsub.f32 0.0, %v73_v3  ;;  %v103_v33 = vmul.f32 %v69_v26, %v67_v1  ;;  %p243_p4 = pnand %p241_p3, %p238_p2 }
  0x2b   :  { %v76_v6 = vmul.f32 1.442695, %v74_v4  ;;  %v78_v7 = vmul.f32 1.442695, %v75_v5 }
  0x2d   :  { %185 = vpow2.f32 %v76_v6 }
  0x2e   :  { %187 = vpow2.f32 %v78_v7 }
  0x37   :  { %v186_v8 = vpop.eup %185 }
  0x38   :  { %v188_v9 = vpop.eup %187  ;;  %v80_v10 = vadd.f32 1.0, %v186_v8  ;;  %v83_v12 = vmul.f32 -0.5, %v186_v8  ;;  %v86_v15 = vand.u32 2147483647, %v186_v8 }
  0x39   :  { %v89_v11 = vadd.f32 1.0, %v188_v9  ;;  %v92_v13 = vmul.f32 -0.5, %v188_v9  ;;  %v95_v17 = vand.u32 2147483647, %v188_v9 }
  0x3a   :  { %189 = vlog2.f32 %v80_v10  ;;  %v84_v14 = vadd.f32 1.0, %v83_v12  ;;  %vm87_vm0 = vcmp.lt.f32.partialorder %v86_v15, 0.0004427343 }
  0x3b   :  { %191 = vlog2.f32 %v89_v11  ;;  %v93_v16 = vadd.f32 1.0, %v92_v13  ;;  %vm96_vm1 = vcmp.lt.f32.partialorder %v95_v17, 0.0004427343 }
  0x3c   :  { %v85_v18 = vmul.f32 %v186_v8, %v84_v14 }
  0x3d   :  { %v94_v21 = vmul.f32 %v188_v9, %v93_v16 }
  0x44   :  { %v190_v19 = vpop.eup %189 }
  0x45   :  { %v192_v22 = vpop.eup %191  ;;  %v82_v25 = vmul.f32 0.6931472, %v190_v19 }
  0x46   :  { %v91_v27 = vmul.f32 0.6931472, %v192_v22 }
  0x47   :  { %v88_v28 = vsel %vm87_vm0, %v85_v18, %v82_v25 }
  0x48   :  { %v97_v29 = vsel %vm96_vm1, %v94_v21, %v91_v27  ;;  %v98_v30 = vadd.f32 %v88_v28, %v70_v20 }
  0x49   :  { %v99_v32 = vadd.f32 %v97_v29, %v71_v24 }
  0x4a   :  { %v100_v34 = vmin.f32 %v98_v30, 100.0 }
  0x4b   :  { %v101_v35 = vmin.f32 %v99_v32, 100.0 }
  0x4c   :  { %v104_v36 = vsub.f32 %v100_v34, %v102_v31 }
  0x4d   :  { %v105_v37 = vsub.f32 %v101_v35, %v103_v33 }
  0x4f   :  { %v114_v38 = vadd.f32 %v105_v37, %v104_v36 }
  0x51   :  { %148 = vadd.xlane.f32.xlu0 %v114_v38 }
  0xde   :  { %v149_v39 = vpop.xlane.xlu0 %148 }
  0xdf   :  { %v150_v40 = vrot.slane %v149_v39, 4 }
  0xe1   :  { %v151_v41 = vadd.f32 %v150_v40, %v149_v39 }
  0xe3   :  { %v152_v42 = vrot.slane %v151_v41, 2 }
  0xe5   :  { %v153_v43 = vadd.f32 %v152_v42, %v151_v41 }
  0xe7   :  { %v154_v44 = vrot.slane %v153_v43, 1 }
  0xe9   :  { %v155_v45 = vadd.f32 %v154_v44, %v153_v43 }
  0xeb   :  { %178 = vpush %v155_v45 }
 0x11c   :  { %s179_s1 = spop %178 }
 0x11d   :  { %158 = sst [smem:[#allocation8]] %s179_s1 }
 0x11e   :  { %246 = shalt.err (!%p243_p4)
}
 0x11f   :  { %s257_s13 = smov [#allocation8]  }
 0x120   :  { %166 = dma.smem_to_hbm %s257_s13, 16, %s311_s2, [#allocation5]  }
 0x121   :  { %251 = dma.done.wait [#allocation5], 16  }
 0x122   :  { %252 = vsyncadd [#allocation5], 4294967280 }
 0x123   :  { %170 = sfence }
 0x124   :  { %171 = vsyncpa [#allocation4], 1 }
 0x125   :  { %172 = vsyncpa [#allocation7], 1 }
 0x126   :  { %173 = vsyncpa [#allocation5], 1 }

</bundles_post_ra>
